<compile_context>
chip_gen: v5e
topology: v5e:2x2
jax: 0.10.0
libtpu: 0.0.40
codegen_flags: <defaults>
</compile_context>

<pallas_src>
import jax
import jax.numpy as jnp
from jax.experimental import pallas as pl
from jax.experimental.pallas import tpu as pltpu


def _round_up(x, m):
    return ((x + m - 1) // m) * m


def _pick_tile(n, candidates):
    for c in candidates:
        if n % c == 0:
            return c
    return n


def _pick_dst_tile(n):
    """Largest 128-multiple tile that still yields >= 2 dst blocks (so the
    'parallel' dst axis can shard across v7x's two TensorCores); otherwise the
    largest divisor tile."""
    for c in (1024, 512, 256, 128):
        if n % c == 0 and n // c >= 2:
            return c
    return _pick_tile(n, (1024, 512, 256, 128))


# ---------------------------------------------------------------------------
# Pallas kernels
# ---------------------------------------------------------------------------
def _proj_kernel(h_ref, w_ref, hw_ref):
    """HW[row_tile] = H[row_tile] @ [W_0 | ... | W_{R-1} | W_self]  (bf16 out).

    Single pass over H; the concatenated weight gives a lane-dense matmul N
    dimension of (R+1)*Dout_p (>= 256 -> full-width MXU on v6e/v7x).
    """
    acc = jnp.dot(h_ref[...], w_ref[...], preferred_element_type=jnp.float32)
    hw_ref[...] = acc.astype(hw_ref.dtype)


def _rgcn_agg_kernel(adj_ref, hw_ref, hw_self_ref, out_ref):
    """out[dst_tile] = relu( H[dst_tile] @ W_self
                             + sum_{r, s} A[r, dst_tile, src_tile_s] @ HW_r[src_tile_s] )

    Grid = (dst tiles ["parallel"], relations ["arbitrary"], src tiles ["arbitrary"]).
    The output block index depends only on the dst axis, so it stays VMEM
    resident across the whole (r, s) reduction and serves as the f32
    accumulator.  Both matmul operands are bf16 (native MXU rate); accumulation
    is f32 via preferred_element_type.
    """
    r = pl.program_id(1)
    s = pl.program_id(2)
    first = jnp.logical_and(r == 0, s == 0)
    last = jnp.logical_and(r == pl.num_programs(1) - 1,
                           s == pl.num_programs(2) - 1)

    contrib = jnp.dot(adj_ref[0], hw_ref[...],
                      preferred_element_type=jnp.float32)

    @pl.when(first)
    def _():
        # Direct store (no zero-init + add): self-loop projection + first block.
        out_ref[...] = hw_self_ref[...].astype(jnp.float32) + contrib

    @pl.when(jnp.logical_not(first))
    def _():
        out_ref[...] += contrib

    @pl.when(last)
    def _():
        # activation=F.relu; bias=None; dropout in eval mode -> identity
        out_ref[...] = jnp.maximum(out_ref[...], 0.0)


# ---------------------------------------------------------------------------
# Wrappers
# ---------------------------------------------------------------------------
def build_padded_adjacency(adj, n_pad):
    """adj (R, N, N) f32 -> (R, n_pad, n_pad) bf16 (no identity plane; the
    self-loop is handled via the HW_self input of the aggregation kernel).
    bf16 is exact for small integer edge multiplicities (asserted by caller)."""
    R, N, _ = adj.shape
    out = jnp.zeros((R, n_pad, n_pad), jnp.bfloat16)
    return out.at[:, :N, :N].set(adj.astype(jnp.bfloat16))


def rgcn_layer(adj_pad, h_pad, bases, w_comp, w_self):
    """One RGCN layer on padded activations.

    adj_pad: (R, Np, Np) bf16 padded adjacency.
    h_pad  : (Np, Din_p) f32 padded node features (padded rows/cols are 0).
    bases  : (B, Din, Dout), w_comp: (R, B), w_self: (Din, Dout).
    Returns (Np, Dout_p) f32, exactly zero in padded rows/cols.
    """
    R, Np, _ = adj_pad.shape
    B, Din, Dout = bases.shape
    Din_p = _round_up(Din, 128)
    Dout_p = _round_up(Dout, 128)
    R1 = R + 1
    assert h_pad.shape == (Np, Din_p)

    # Basis composition (sub-vreg work -> plain XLA), append the self-loop
    # weight as relation R, zero-pad and concatenate along the output dim so
    # kernel 1 is one matmul reading H exactly once.
    w_rel = jnp.einsum('rb,bio->rio', w_comp, bases)                 # (R, Din, Dout)
    w_all = jnp.concatenate([w_rel, w_self[None]], axis=0)           # (R1, Din, Dout)
    w_pad = jnp.zeros((R1, Din_p, Dout_p), jnp.float32).at[:, :Din, :Dout].set(w_all)
    w_cat = jnp.transpose(w_pad, (1, 0, 2)).reshape(Din_p, R1 * Dout_p)

    # ---- kernel 1: HW = H @ [W_0 | ... | W_{R-1} | W_self] in bf16 ----------
    t_row = _pick_dst_tile(Np)
    hw = pl.pallas_call(
        _proj_kernel,
        out_shape=jax.ShapeDtypeStruct((Np, R1 * Dout_p), jnp.bfloat16),
        grid_spec=pltpu.PrefetchScalarGridSpec(
            num_scalar_prefetch=0,
            grid=(Np // t_row,),
            in_specs=[
                pl.BlockSpec((t_row, Din_p), lambda i: (i, 0)),
                pl.BlockSpec((Din_p, R1 * Dout_p), lambda i: (0, 0)),
            ],
            out_specs=pl.BlockSpec((t_row, R1 * Dout_p), lambda i: (i, 0)),
        ),
        compiler_params=pltpu.CompilerParams(
            dimension_semantics=("parallel",)),
    )(h_pad, w_cat)

    # ---- kernel 2: out = relu(HW_self + sum_{r,s} A_tile @ HW_tile) ---------
    t_dst = _pick_dst_tile(Np)
    t_src = _pick_tile(Np, (2048, 1024, 512, 256, 128))
    out_pad = pl.pallas_call(
        _rgcn_agg_kernel,
        out_shape=jax.ShapeDtypeStruct((Np, Dout_p), jnp.float32),
        grid_spec=pltpu.PrefetchScalarGridSpec(
            num_scalar_prefetch=0,
            grid=(Np // t_dst, R, Np // t_src),
            in_specs=[
                # bf16 adjacency tile, streamed over (relation, src) reduction
                pl.BlockSpec((1, t_dst, t_src), lambda i, r, s: (r, i, s)),
                # bf16 HW tile for relation r, src tile s
                pl.BlockSpec((t_src, Dout_p), lambda i, r, s: (s, r)),
                # bf16 self-loop projection H @ W_self for this dst tile
                # (block index constant across (r, s) -> fetched once per dst tile)
                pl.BlockSpec((t_dst, Dout_p), lambda i, r, s: (i, R)),
            ],
            out_specs=pl.BlockSpec((t_dst, Dout_p), lambda i, r, s: (i, 0)),
        ),
        compiler_params=pltpu.CompilerParams(
            dimension_semantics=("parallel", "arbitrary", "arbitrary"),
            # Explicit limit: covers v5e's 16 MiB default scoped VMEM for the
            # larger (1024, 2048) tile configs; well within v7x's 64 MiB.
            vmem_limit_bytes=32 * 1024 * 1024),
    )(adj_pad, hw, hw)

    return out_pad


def rgcn_forward(h0, adj, layer_params):
    """RGCN.forward: run all layers, return final node embeddings (kl_losses == []).

    Activations stay padded (Np, D_p) across layers; a single slice at the end
    recovers (N, Dout)."""
    N, Din0 = h0.shape
    Np = _round_up(max(N, 8), 128)
    adj_pad = build_padded_adjacency(adj, Np)   # built once, reused by every layer

    Din_p = _round_up(Din0, 128)
    h_pad = jnp.zeros((Np, Din_p), jnp.float32).at[:N, :Din0].set(h0)

    for (bases, w_comp, w_self) in layer_params:
        Din = bases.shape[1]
        assert h_pad.shape[1] == _round_up(Din, 128), "layer dims must chain"
        h_pad = rgcn_layer(adj_pad, h_pad, bases, w_comp, w_self)

    Dout = layer_params[-1][0].shape[-1]
    return h_pad[:N, :Dout], []


# Pure-JAX reference of one layer (for correctness check).
def rgcn_layer_ref(adj, h, bases, w_comp, w_self):
    w_rel = jnp.einsum('rb,bio->rio', w_comp, bases)
    nei = jnp.einsum('rvu,ui,rio->vo', adj, h, w_rel)
    return jax.nn.relu(nei + h @ w_self)


# ---------------------------------------------------------------------------
# Parameter / graph construction (deterministic, synthetic)
# ---------------------------------------------------------------------------
def xavier_uniform(key, shape):
    fan_in, fan_out = shape[-2], shape[-1]
    bound = (6.0 / (fan_in + fan_out)) ** 0.5
    return jax.random.uniform(key, shape, jnp.float32, -bound, bound)


if __name__ == "__main__":
    # Small config consistent with the module's __init__
    N = 16              # number of graph nodes
    inp_dim = 8         # params.inp_dim
    emb_dim = 16        # params.emb_dim
    aug_num_rels = 4    # params.aug_num_rels (relations used by RGCNBasisLayer)
    num_bases = 2       # params.num_bases
    num_gcn_layers = 2  # params.num_gcn_layers -> 1 input layer + 1 hidden layer

    key = jax.random.PRNGKey(0)
    keys = jax.random.split(key, 16)

    # Graph: ring edges (v+1)%N -> v guarantee in-degree >= 1, plus random edges.
    dsts_ring = jnp.arange(N, dtype=jnp.int32)
    srcs_ring = (dsts_ring + 1) % N
    types_ring = dsts_ring % aug_num_rels
    n_extra = 24
    srcs_x = jax.random.randint(keys[0], (n_extra,), 0, N, dtype=jnp.int32)
    dsts_x = jax.random.randint(keys[1], (n_extra,), 0, N, dtype=jnp.int32)
    types_x = jax.random.randint(keys[2], (n_extra,), 0, aug_num_rels, dtype=jnp.int32)
    srcs = jnp.concatenate([srcs_ring, srcs_x])
    dsts = jnp.concatenate([dsts_ring, dsts_x])
    etypes = jnp.concatenate([types_ring, types_x])

    adj = jnp.zeros((aug_num_rels, N, N), jnp.float32).at[etypes, dsts, srcs].add(1.0)
    # bf16 adjacency streaming is exact only for small integer multiplicities.
    assert float(adj.max()) <= 256.0

    # Initial node features g.ndata['feat'] : (N, inp_dim)
    h0 = jax.random.normal(keys[3], (N, inp_dim), jnp.float32)

    # Layer parameters: input layer (inp_dim -> emb_dim) + hidden layers (emb -> emb)
    layer_dims = [(inp_dim, emb_dim)] + [(emb_dim, emb_dim)] * (num_gcn_layers - 1)
    layer_params = []
    k = 4
    for (din, dout) in layer_dims:
        bases = xavier_uniform(keys[k], (num_bases, din, dout)); k += 1
        w_comp = xavier_uniform(keys[k], (aug_num_rels, num_bases)); k += 1
        w_self = xavier_uniform(keys[k], (din, dout)); k += 1
        layer_params.append((bases, w_comp, w_self))

    # Run the Pallas RGCN
    h_out, kl_losses = rgcn_forward(h0, adj, layer_params)
    h_out = jax.block_until_ready(h_out)

    # Correctness check against pure-JAX f32 reference.  HW is stored in bf16
    # (accumulation stays f32), so the tolerance is loosened accordingly.
    h_ref = h0
    for (bases, w_comp, w_self) in layer_params:
        h_ref = rgcn_layer_ref(adj, h_ref, bases, w_comp, w_self)
    assert h_out.shape == (N, emb_dim)
    assert kl_losses == []
    max_err = float(jnp.max(jnp.abs(h_out - h_ref)))
    assert jnp.allclose(h_out, h_ref, rtol=3e-2, atol=3e-2), f"max_err={max_err}"

    print("KERNEL_OK")
</pallas_src>

<mosaic_0001>
module attributes {stable_mosaic.version = 11 : i64} {
  func.func @_proj_kernel(%arg0: i32, %arg1: memref<128x128xf32, #tpu.memory_space<vmem>>, %arg2: memref<128x640xf32, #tpu.memory_space<vmem>>, %arg3: memref<128x640xbf16, #tpu.memory_space<vmem>>) attributes {dimension_semantics = [#tpu.dimension_semantics<parallel>], iteration_bounds = array<i64: 1>, scalar_prefetch = 0 : i64, scratch_operands = 0 : i64, tpu.core_type = #tpu.core_type<tc>, window_params = [{transform_indices = @transform_0, window_bounds = array<i64: 128, 128>}, {pipeline_mode = #tpu.pipeline_mode<synchronous>, transform_indices = @transform_1, window_bounds = array<i64: 128, 640>}, {transform_indices = @transform_2, window_bounds = array<i64: 128, 640>}]} {
    %c0 = arith.constant 0 : index
    %c0_0 = arith.constant 0 : index
    %0 = vector.load %arg1[%c0, %c0_0] : memref<128x128xf32, #tpu.memory_space<vmem>>, vector<128x128xf32>
    %c0_1 = arith.constant 0 : index
    %c0_2 = arith.constant 0 : index
    %1 = vector.load %arg2[%c0_1, %c0_2] : memref<128x640xf32, #tpu.memory_space<vmem>>, vector<128x640xf32>
    %cst = arith.constant dense<0.000000e+00> : vector<128x640xf32>
    %2 = tpu.matmul %0, %1, %cst {dimension_numbers = #tpu.dot_dimension_numbers<[1], [0], [0], [1], [0, 0, 1, 1], [], []>} : vector<128x128xf32>, vector<128x640xf32>, vector<128x640xf32> -> vector<128x640xf32>
    %3 = arith.truncf %2 : vector<128x640xf32> to vector<128x640xbf16>
    %c0_3 = arith.constant 0 : index
    %c0_4 = arith.constant 0 : index
    %4 = vector.load %arg3[%c0_3, %c0_4] : memref<128x640xbf16, #tpu.memory_space<vmem>>, vector<128x640xbf16>
    tpu.vector_store %arg3[%c0_3, %c0_4], %3 {strides = array<i32>} : memref<128x640xbf16, #tpu.memory_space<vmem>>, vector<128x640xbf16>,
    return
  }
  func.func @transform_0(%arg0: i32) -> (i32, i32) {
    %c0_i32 = arith.constant 0 : i32
    %c0_i32_0 = arith.constant 0 : i32
    return %arg0, %c0_i32 : i32, i32
  }
  func.func @transform_1(%arg0: i32) -> (i32, i32) {
    %c0_i32 = arith.constant 0 : i32
    %c0_i32_0 = arith.constant 0 : i32
    %c0_i32_1 = arith.constant 0 : i32
    return %c0_i32, %c0_i32_0 : i32, i32
  }
  func.func @transform_2(%arg0: i32) -> (i32, i32) {
    %c0_i32 = arith.constant 0 : i32
    %c0_i32_0 = arith.constant 0 : i32
    return %arg0, %c0_i32 : i32, i32
  }
}

</mosaic_0001>

<bundles_post_ra>
// kernel: tpu_custom_call.1
= control target key start
LH: loop header
LB: loop body
LE: loop exit
PB: predicated region body
PF: predicated region fallthrough
CT: control target
= control target key end

     0   :  { %7 = vsyncpa [#allocation3], 0  ;;  %s890_s0 = inlined_call_operand.hbm [shape: f32[128,128], index: 0, kind: input, shape index: {}]   ;;  %s891_s1 = inlined_call_operand.hbm [shape: f32[128,640], index: 1, kind: input, shape index: {}]   ;;  %s892_s2 = inlined_call_operand.hbm [shape: bf16[128,640], index: 2, kind: output, shape index: {}]  }
   0x1   :  { %8 = vsyncpa [#allocation6], 0 }
   0x2   :  { %9 = vsyncpa [#allocation4], 0  ;;  %s14_s11 = sshll.u32 %s890_s0, 4  ;;  %s716_s12 = smov [#allocation2]   ;;  %s15_s11 = int_to_ptr.hbm [resolvable:$true] %s14_s11 }
   0x3   :  { %s16_s13 = sshll.u32 %s716_s12, 4  ;;  %s27_s16 = sshll.u32 %s891_s1, 4  ;;  %s17_s13 = int_to_ptr.vmem [resolvable:$true] %s16_s13  ;;  %s28_s16 = int_to_ptr.hbm [resolvable:$true] %s27_s16 }
   0x4   :  { %s717_s17 = smov 128   ;;  %s718_s18 = smov 8  }
   0x5   :  { %22 = dma.hbm_to_vmem [thread:$0]  %s15_s11, 2048, %s17_s13, [#allocation3], %s717_s17, %s717_s17, %s718_s18  }
   0x6   :  { %s719_s19 = smov [#allocation5]   ;;  %s720_s21 = smov 640  }
   0x7   :  { %s29_s20 = sshll.u32 %s719_s19, 4  ;;  %s721_s22 = smov 40   ;;  %s30_s20 = int_to_ptr.vmem [resolvable:$true] %s29_s20 }
   0x8   :  { %35 = dma.hbm_to_vmem [thread:$0]  %s28_s16, 10240, %s30_s20, [#allocation6], %s720_s21, %s720_s21, %s721_s22  }
   0x9   :  { %710 = dma.done.wait [#allocation3], 2048  }
   0xa   :  { %711 = vsyncadd [#allocation3], 4294965248 }
   0xb   :  { %712 = dma.done.wait [#allocation6], 10240  }
   0xc   :  { %713 = vsyncadd [#allocation6], 4294957056  ;;  %v135_v0 = vld [vmem:[#allocation5 + $0x258] sm:$0xff]  ;;  %v130_v1 = vld [vmem:[#allocation5 + $0x230] sm:$0xff]  ;;  %s722_s0 = smov [#allocation7]   ;;  %s567_s25 = sshll.u32 %s892_s2, 4  ;;  %s568_s25 = int_to_ptr.hbm [resolvable:$true] %s567_s25 }
   0xd   :  { %581 = vmatpush.msra.mxu1 %v135_v0  ;;  %582 = vmatpush.msra.mxu2 %v135_v0  ;;  %v125_v2 = vld [vmem:[#allocation5 + $0x208] sm:$0xff]  ;;  %v120_v3 = vld [vmem:[#allocation5 + $0x1e0] sm:$0xff]  ;;  %v115_v4 = vld [vmem:[#allocation5 + $0x1b8] sm:$0xff]  ;;  %s565_s1 = sshll.u32 %s722_s0, 4  ;;  %s723_s26 = smov 320   ;;  %s566_s1 = int_to_ptr.vmem [resolvable:$true] %s565_s1 }
   0xe   :  { %583 = vmatpush.msra.mxu3 %v135_v0  ;;  %140 = vmatpush.msra.mxu0 %v135_v0  ;;  %v110_v5 = vld [vmem:[#allocation5 + $0x190] sm:$0xff]  ;;  %v105_v6 = vld [vmem:[#allocation5 + $0x168] sm:$0xff]  ;;  %v100_v7 = vld [vmem:[#allocation5 + $0x140] sm:$0xff]  ;;  %s724_s27 = smov 20  }
   0xf   :  { %584 = vmatpush.msra.mxu1 %v130_v1  ;;  %585 = vmatpush.msra.mxu2 %v130_v1  ;;  %v95_v8 = vld [vmem:[#allocation5 + $0x118] sm:$0xff]  ;;  %v90_v9 = vld [vmem:[#allocation5 + $0xf0] sm:$0xff]  ;;  %v85_v10 = vld [vmem:[#allocation5 + $0xc8] sm:$0xff] }
  0x10   :  { %586 = vmatpush.msra.mxu3 %v130_v1  ;;  %141 = vmatpush.msra.mxu0 %v130_v1  ;;  %v80_v11 = vld [vmem:[#allocation5 + $0xa0] sm:$0xff]  ;;  %v75_v12 = vld [vmem:[#allocation5 + $0x78] sm:$0xff]  ;;  %v70_v13 = vld [vmem:[#allocation5 + $0x50] sm:$0xff] }
  0x11   :  { %587 = vmatpush.msra.mxu1 %v125_v2  ;;  %588 = vmatpush.msra.mxu2 %v125_v2  ;;  %v65_v14 = vld [vmem:[#allocation5 + $0x28] sm:$0xff]  ;;  %v60_v15 = vld [vmem:[#allocation5] sm:$0xff]  ;;  %v138_v20 = vld [vmem:[#allocation5 + $0x270] sm:$0xff] }
  0x12   :  { %589 = vmatpush.msra.mxu3 %v125_v2  ;;  %142 = vmatpush.msra.mxu0 %v125_v2  ;;  %v746_v16 = vld [vmem:[#allocation2 + $0x20] sm:$0xff]  ;;  %v137_v19 = vld [vmem:[#allocation5 + $0x268] sm:$0xff]  ;;  %v131_v24 = vld [vmem:[#allocation5 + $0x238] sm:$0xff] }
  0x13   :  { %590 = vmatpush.msra.mxu1 %v120_v3  ;;  %591 = vmatpush.msra.mxu2 %v120_v3  ;;  %v748_v17 = vld [vmem:[#allocation2 + $0x40] sm:$0xff]  ;;  %v133_v23 = vld [vmem:[#allocation5 + $0x248] sm:$0xff]  ;;  %v127_v26 = vld [vmem:[#allocation5 + $0x218] sm:$0xff] }
  0x14   :  { %592 = vmatpush.msra.mxu3 %v120_v3  ;;  %143 = vmatpush.msra.mxu0 %v120_v3  ;;  %v750_v18 = vld [vmem:[#allocation2 + $0x60] sm:$0xff]  ;;  %v126_v28 = vld [vmem:[#allocation5 + $0x210] sm:$0xff]  ;;  %v139_v29 = vld [vmem:[#allocation5 + $0x278] sm:$0xff] }
  0x15   :  { %593 = vmatpush.msra.mxu1 %v115_v4  ;;  %594 = vmatpush.msra.mxu2 %v115_v4  ;;  %v136_v21 = vld [vmem:[#allocation5 + $0x260] sm:$0xff]  ;;  %v122_v30 = vld [vmem:[#allocation5 + $0x1f0] sm:$0xff]  ;;  %v123_v31 = vld [vmem:[#allocation5 + $0x1f8] sm:$0xff] }
  0x16   :  { %595 = vmatpush.msra.mxu3 %v115_v4  ;;  %144 = vmatpush.msra.mxu0 %v115_v4  ;;  %v132_v22 = vld [vmem:[#allocation5 + $0x240] sm:$0xff]  ;;  %v121_v32 = vld [vmem:[#allocation5 + $0x1e8] sm:$0xff]  ;;  %v118_v37 = vld [vmem:[#allocation5 + $0x1d0] sm:$0xff] }
  0x17   :  { %596 = vmatpush.msra.mxu1 %v110_v5  ;;  %597 = vmatpush.msra.mxu2 %v110_v5  ;;  %v755_v25 = vld [vmem:[#allocation2] sm:$0xff]  ;;  %v758_v33 = vld [vmem:[#allocation2 + $0x48] sm:$0xff]  ;;  %v134_v38 = vld [vmem:[#allocation5 + $0x250] sm:$0xff] }
  0x18   :  { %598 = vmatpush.msra.mxu3 %v110_v5  ;;  %145 = vmatpush.msra.mxu0 %v110_v5  ;;  %v128_v27 = vld [vmem:[#allocation5 + $0x220] sm:$0xff]  ;;  %v760_v34 = vld [vmem:[#allocation2 + $0x28] sm:$0xff]  ;;  %v111_v43 = vld [vmem:[#allocation5 + $0x198] sm:$0xff] }
  0x19   :  { %599 = vmatpush.msra.mxu1 %v105_v6  ;;  %600 = vmatpush.msra.mxu2 %v105_v6  ;;  %v762_v35 = vld [vmem:[#allocation2 + $0x68] sm:$0xff]  ;;  %v116_v39 = vld [vmem:[#allocation5 + $0x1c0] sm:$0xff]  ;;  %v107_v44 = vld [vmem:[#allocation5 + $0x178] sm:$0xff] }
  0x1a   :  { %601 = vmatpush.msra.mxu3 %v105_v6  ;;  %146 = vmatpush.msra.mxu0 %v105_v6  ;;  %v117_v36 = vld [vmem:[#allocation5 + $0x1c8] sm:$0xff]  ;;  %v112_v40 = vld [vmem:[#allocation5 + $0x1a0] sm:$0xff]  ;;  %v106_v47 = vld [vmem:[#allocation5 + $0x170] sm:$0xff] }
  0x1b   :  { %602 = vmatpush.msra.mxu1 %v100_v7  ;;  %603 = vmatpush.msra.mxu2 %v100_v7  ;;  %v113_v41 = vld [vmem:[#allocation5 + $0x1a8] sm:$0xff]  ;;  %v108_v45 = vld [vmem:[#allocation5 + $0x180] sm:$0xff]  ;;  %v102_v49 = vld [vmem:[#allocation5 + $0x150] sm:$0xff] }
  0x1c   :  { %604 = vmatpush.msra.mxu3 %v100_v7  ;;  %147 = vmatpush.msra.mxu0 %v100_v7  ;;  %v129_v42 = vld [vmem:[#allocation5 + $0x228] sm:$0xff]  ;;  %v124_v46 = vld [vmem:[#allocation5 + $0x200] sm:$0xff]  ;;  %v103_v50 = vld [vmem:[#allocation5 + $0x158] sm:$0xff] }
  0x1d   :  { %605 = vmatpush.msra.mxu1 %v95_v8  ;;  %606 = vmatpush.msra.mxu2 %v95_v8  ;;  %v767_v48 = vld [vmem:[#allocation2 + $0x8] sm:$0xff]  ;;  %v119_v51 = vld [vmem:[#allocation5 + $0x1d8] sm:$0xff]  ;;  %v769_v53 = vld [vmem:[#allocation2 + $0x50] sm:$0xff] }
  0x1e   :  { %607 = vmatpush.msra.mxu3 %v95_v8  ;;  %148 = vmatpush.msra.mxu0 %v95_v8  ;;  %v101_v52 = vld [vmem:[#allocation5 + $0x148] sm:$0xff]  ;;  %v772_v54 = vld [vmem:[#allocation2 + $0x30] sm:$0xff]  ;;  %v96_v59 = vld [vmem:[#allocation5 + $0x120] sm:$0xff] }
  0x1f   :  { %608 = vmatpush.msra.mxu1 %v90_v9  ;;  %609 = vmatpush.msra.mxu2 %v90_v9  ;;  %v774_v55 = vld [vmem:[#allocation2 + $0x70] sm:$0xff]  ;;  %v97_v56 = vld [vmem:[#allocation5 + $0x128] sm:$0xff]  ;;  %v92_v60 = vld [vmem:[#allocation5 + $0x100] sm:$0xff] }
  0x20   :  { %610 = vmatpush.msra.mxu3 %v90_v9  ;;  %149 = vmatpush.msra.mxu0 %v90_v9  ;;  %v98_v57 = vld [vmem:[#allocation5 + $0x130] sm:$0xff]  ;;  %v93_v61 = vld [vmem:[#allocation5 + $0x108] sm:$0xff]  ;;  %v91_v63 = vld [vmem:[#allocation5 + $0xf8] sm:$0xff] }
  0x21   :  { %611 = vmatpush.msra.mxu1 %v85_v10  ;;  %612 = vmatpush.msra.mxu2 %v85_v10  ;;  %v114_v58 = vld [vmem:[#allocation5 + $0x1b0] sm:$0xff]  ;;  %v109_v62 = vld [vmem:[#allocation5 + $0x188] sm:$0xff]  ;;  %v87_v0 = vld [vmem:[#allocation5 + $0xd8] sm:$0xff] }
  0x22   :  { %613 = vmatpush.msra.mxu3 %v85_v10  ;;  %150 = vmatpush.msra.mxu0 %v85_v10  ;;  %v88_v1 = vld [vmem:[#allocation5 + $0xe0] sm:$0xff]  ;;  %v86_v3 = vld [vmem:[#allocation5 + $0xd0] sm:$0xff]  ;;  %v83_v6 = vld [vmem:[#allocation5 + $0xb8] sm:$0xff] }
  0x23   :  { %614 = vmatpush.msra.mxu1 %v80_v11  ;;  %615 = vmatpush.msra.mxu2 %v80_v11  ;;  %v104_v2 = vld [vmem:[#allocation5 + $0x160] sm:$0xff]  ;;  %v779_v4 = vld [vmem:[#allocation2 + $0x10] sm:$0xff]  ;;  %v99_v7 = vld [vmem:[#allocation5 + $0x138] sm:$0xff] }
  0x24   :  { %616 = vmatpush.msra.mxu3 %v80_v11  ;;  %151 = vmatpush.msra.mxu0 %v80_v11  ;;  %v82_v5 = vld [vmem:[#allocation5 + $0xb0] sm:$0xff]  ;;  %v81_v8 = vld [vmem:[#allocation5 + $0xa8] sm:$0xff]  ;;  %v781_v9 = vld [vmem:[#allocation2 + $0x58] sm:$0xff] }
  0x25   :  { %617 = vmatpush.msra.mxu1 %v75_v12  ;;  %618 = vmatpush.msra.mxu2 %v75_v12  ;;  %v784_v10 = vld [vmem:[#allocation2 + $0x38] sm:$0xff] }
  0x26   :  { %619 = vmatpush.msra.mxu3 %v75_v12  ;;  %152 = vmatpush.msra.mxu0 %v75_v12  ;;  %v786_v11 = vld [vmem:[#allocation2 + $0x78] sm:$0xff]  ;;  %v77_v12 = vld [vmem:[#allocation5 + $0x88] sm:$0xff] }
  0x27   :  { %620 = vmatpush.msra.mxu1 %v70_v13  ;;  %621 = vmatpush.msra.mxu2 %v70_v13 }
  0x28   :  { %622 = vmatpush.msra.mxu3 %v70_v13  ;;  %153 = vmatpush.msra.mxu0 %v70_v13  ;;  %v78_v13 = vld [vmem:[#allocation5 + $0x90] sm:$0xff] }
  0x29   :  { %623 = vmatpush.msra.mxu1 %v65_v14  ;;  %624 = vmatpush.msra.mxu2 %v65_v14 }
  0x2a   :  { %625 = vmatpush.msra.mxu3 %v65_v14  ;;  %154 = vmatpush.msra.mxu0 %v65_v14  ;;  %v94_v14 = vld [vmem:[#allocation5 + $0x110] sm:$0xff] }
  0x2b   :  { %626 = vmatpush.msra.mxu1 %v60_v15  ;;  %627 = vmatpush.msra.mxu2 %v60_v15 }
  0x2c   :  { %628 = vmatpush.msra.mxu3 %v60_v15  ;;  %168 = vmatmul.f32.vlgmr.msra.gmra.mxu1 %v746_v16 }
  0x2d   :  { %180 = vmatmul.f32.vlgmr.msra.gmra.mxu2 %v748_v17  ;;  %192 = vmatmul.f32.vlgmr.msra.gmra.mxu3 %v750_v18 }
  0x2e   :  { %270 = vmatpush.msrb.mxu2 %v137_v19  ;;  %335 = vmatpush.msrb.mxu3 %v138_v20  ;;  %v72_v19 = vld [vmem:[#allocation5 + $0x60] sm:$0xff]  ;;  %v73_v20 = vld [vmem:[#allocation5 + $0x68] sm:$0xff] }
  0x2f   :  { %205 = vmatpush.msrb.mxu1 %v136_v21  ;;  %155 = vmatpush.msra.mxu0 %v60_v15  ;;  %v76_v15 = vld [vmem:[#allocation5 + $0x80] sm:$0xff]  ;;  %v89_v21 = vld [vmem:[#allocation5 + $0xe8] sm:$0xff] }
  0x30   :  { %271 = vmatpush.msrb.mxu2 %v132_v22  ;;  %336 = vmatpush.msrb.mxu3 %v133_v23  ;;  %v71_v22 = vld [vmem:[#allocation5 + $0x58] sm:$0xff] }
  0x31   :  { %206 = vmatpush.msrb.mxu1 %v131_v24  ;;  %156 = vmatmul.f32.vlgmr.msra.gmra.mxu0 %v755_v25  ;;  %v67_v23 = vld [vmem:[#allocation5 + $0x38] sm:$0xff]  ;;  %v68_v24 = vld [vmem:[#allocation5 + $0x40] sm:$0xff] }
  0x32   :  { %272 = vmatpush.msrb.mxu2 %v127_v26  ;;  %337 = vmatpush.msrb.mxu3 %v128_v27  ;;  %v84_v26 = vld [vmem:[#allocation5 + $0xc0] sm:$0xff]  ;;  %v66_v27 = vld [vmem:[#allocation5 + $0x30] sm:$0xff] }
  0x33   :  { %207 = vmatpush.msrb.mxu1 %v126_v28  ;;  %400 = vmatpush.msrb.mxu0 %v139_v29  ;;  %v47_v28 = vld [vmem:[#allocation2 + $0x18] sm:$0xff]  ;;  %v62_v29 = vld [vmem:[#allocation5 + $0x10] sm:$0xff] }
  0x34   :  { %273 = vmatpush.msrb.mxu2 %v122_v30  ;;  %338 = vmatpush.msrb.mxu3 %v123_v31  ;;  %v63_v30 = vld [vmem:[#allocation5 + $0x18] sm:$0xff] }
  0x35   :  { %208 = vmatpush.msrb.mxu1 %v121_v32  ;;  %183 = vmatmul.f32.gmra.mxu2 %v758_v33  ;;  %v79_v31 = vld [vmem:[#allocation5 + $0x98] sm:$0xff]  ;;  %v61_v32 = vld [vmem:[#allocation5 + $0x8] sm:$0xff] }
  0x36   :  { %171 = vmatmul.f32.gmra.mxu1 %v760_v34  ;;  %195 = vmatmul.f32.gmra.mxu3 %v762_v35 }
  0x37   :  { %274 = vmatpush.msrb.mxu2 %v117_v36  ;;  %339 = vmatpush.msrb.mxu3 %v118_v37  ;;  %v74_v36 = vld [vmem:[#allocation5 + $0x70] sm:$0xff]  ;;  %v69_v37 = vld [vmem:[#allocation5 + $0x48] sm:$0xff] }
  0x38   :  { %401 = vmatpush.msrb.mxu0 %v134_v38  ;;  %209 = vmatpush.msrb.mxu1 %v116_v39  ;;  %v64_v38 = vld [vmem:[#allocation5 + $0x20] sm:$0xff] }
  0x39   :  { %275 = vmatpush.msrb.mxu2 %v112_v40  ;;  %340 = vmatpush.msrb.mxu3 %v113_v41 }
  0x3a   :  { %402 = vmatpush.msrb.mxu0 %v129_v42  ;;  %210 = vmatpush.msrb.mxu1 %v111_v43 }
  0x3b   :  { %276 = vmatpush.msrb.mxu2 %v107_v44  ;;  %341 = vmatpush.msrb.mxu3 %v108_v45 }
  0x3c   :  { %403 = vmatpush.msrb.mxu0 %v124_v46  ;;  %211 = vmatpush.msrb.mxu1 %v106_v47 }
  0x3d   :  { %159 = vmatmul.f32.gmra.mxu0 %v767_v48  ;;  %277 = vmatpush.msrb.mxu2 %v102_v49 }
  0x3e   :  { %342 = vmatpush.msrb.mxu3 %v103_v50  ;;  %404 = vmatpush.msrb.mxu0 %v119_v51 }
  0x3f   :  { %212 = vmatpush.msrb.mxu1 %v101_v52  ;;  %186 = vmatmul.f32.gmra.mxu2 %v769_v53 }
  0x40   :  { %174 = vmatmul.f32.gmra.mxu1 %v772_v54  ;;  %198 = vmatmul.f32.gmra.mxu3 %v774_v55 }
  0x41   :  { %278 = vmatpush.msrb.mxu2 %v97_v56  ;;  %343 = vmatpush.msrb.mxu3 %v98_v57 }
  0x42   :  { %405 = vmatpush.msrb.mxu0 %v114_v58  ;;  %213 = vmatpush.msrb.mxu1 %v96_v59 }
  0x43   :  { %279 = vmatpush.msrb.mxu2 %v92_v60  ;;  %344 = vmatpush.msrb.mxu3 %v93_v61 }
  0x44   :  { %406 = vmatpush.msrb.mxu0 %v109_v62  ;;  %214 = vmatpush.msrb.mxu1 %v91_v63 }
  0x45   :  { %280 = vmatpush.msrb.mxu2 %v87_v0  ;;  %345 = vmatpush.msrb.mxu3 %v88_v1 }
  0x46   :  { %407 = vmatpush.msrb.mxu0 %v104_v2  ;;  %215 = vmatpush.msrb.mxu1 %v86_v3 }
  0x47   :  { %162 = vmatmul.f32.gmra.mxu0 %v779_v4  ;;  %281 = vmatpush.msrb.mxu2 %v82_v5 }
  0x48   :  { %346 = vmatpush.msrb.mxu3 %v83_v6  ;;  %408 = vmatpush.msrb.mxu0 %v99_v7 }
  0x49   :  { %216 = vmatpush.msrb.mxu1 %v81_v8  ;;  %189 = vmatmul.f32.gmra.mxu2 %v781_v9 }
  0x4a   :  { %177 = vmatmul.f32.gmra.mxu1 %v784_v10  ;;  %201 = vmatmul.f32.gmra.mxu3 %v786_v11 }
  0x4b   :  { %282 = vmatpush.msrb.mxu2 %v77_v12  ;;  %347 = vmatpush.msrb.mxu3 %v78_v13 }
  0x4c   :  { %409 = vmatpush.msrb.mxu0 %v94_v14  ;;  %217 = vmatpush.msrb.mxu1 %v76_v15 }
  0x4d   :  { %283 = vmatpush.msrb.mxu2 %v72_v19  ;;  %348 = vmatpush.msrb.mxu3 %v73_v20 }
  0x4e   :  { %410 = vmatpush.msrb.mxu0 %v89_v21  ;;  %218 = vmatpush.msrb.mxu1 %v71_v22 }
  0x4f   :  { %284 = vmatpush.msrb.mxu2 %v67_v23  ;;  %349 = vmatpush.msrb.mxu3 %v68_v24 }
  0x50   :  { %411 = vmatpush.msrb.mxu0 %v84_v26  ;;  %219 = vmatpush.msrb.mxu1 %v66_v27 }
  0x51   :  { %165 = vmatmul.f32.gmra.mxu0 %v47_v28  ;;  %285 = vmatpush.msrb.mxu2 %v62_v29 }
  0x52   :  { %350 = vmatpush.msrb.mxu3 %v63_v30  ;;  %412 = vmatpush.msrb.mxu0 %v79_v31 }
  0x53   :  { %220 = vmatpush.msrb.mxu1 %v61_v32  ;;  %286 = vmatmul.f32.vlgmr.msrb.gmra.mxu2 %v755_v25 }
  0x54   :  { %221 = vmatmul.f32.vlgmr.msrb.gmra.mxu1 %v755_v25  ;;  %351 = vmatmul.f32.vlgmr.msrb.gmra.mxu3 %v755_v25 }
  0x55   :  { %413 = vmatpush.msrb.mxu0 %v74_v36 }
  0x57   :  { %414 = vmatpush.msrb.mxu0 %v69_v37 }
  0x59   :  { %415 = vmatpush.msrb.mxu0 %v64_v38 }
  0x5a   :  { %416 = vmatmul.f32.vlgmr.msrb.gmra.mxu0 %v755_v25 }
  0x5b   :  { %289 = vmatmul.f32.gmra.mxu2 %v767_v48 }
  0x5c   :  { %224 = vmatmul.f32.gmra.mxu1 %v767_v48  ;;  %354 = vmatmul.f32.gmra.mxu3 %v767_v48 }
  0x62   :  { %419 = vmatmul.f32.gmra.mxu0 %v767_v48 }
  0x63   :  { %292 = vmatmul.f32.gmra.mxu2 %v779_v4 }
  0x64   :  { %227 = vmatmul.f32.gmra.mxu1 %v779_v4  ;;  %357 = vmatmul.f32.gmra.mxu3 %v779_v4 }
  0x6a   :  { %422 = vmatmul.f32.gmra.mxu0 %v779_v4 }
  0x6b   :  { %295 = vmatmul.f32.gmra.mxu2 %v47_v28 }
  0x6c   :  { %230 = vmatmul.f32.gmra.mxu1 %v47_v28  ;;  %360 = vmatmul.f32.gmra.mxu3 %v47_v28 }
  0x72   :  { %425 = vmatmul.f32.gmra.mxu0 %v47_v28 }
  0x73   :  { %298 = vmatmul.f32.gmra.mxu2 %v746_v16 }
  0x74   :  { %233 = vmatmul.f32.gmra.mxu1 %v746_v16  ;;  %363 = vmatmul.f32.gmra.mxu3 %v746_v16 }
  0x7a   :  { %428 = vmatmul.f32.gmra.mxu0 %v746_v16 }
  0x7b   :  { %301 = vmatmul.f32.gmra.mxu2 %v760_v34 }
  0x7c   :  { %236 = vmatmul.f32.gmra.mxu1 %v760_v34  ;;  %366 = vmatmul.f32.gmra.mxu3 %v760_v34 }
  0x82   :  { %431 = vmatmul.f32.gmra.mxu0 %v760_v34 }
  0x83   :  { %304 = vmatmul.f32.gmra.mxu2 %v772_v54 }
  0x84   :  { %239 = vmatmul.f32.gmra.mxu1 %v772_v54  ;;  %369 = vmatmul.f32.gmra.mxu3 %v772_v54 }
  0x8a   :  { %434 = vmatmul.f32.gmra.mxu0 %v772_v54 }
  0x8b   :  { %307 = vmatmul.f32.gmra.mxu2 %v784_v10 }
  0x8c   :  { %242 = vmatmul.f32.gmra.mxu1 %v784_v10  ;;  %372 = vmatmul.f32.gmra.mxu3 %v784_v10 }
  0x92   :  { %437 = vmatmul.f32.gmra.mxu0 %v784_v10 }
  0x93   :  { %310 = vmatmul.f32.gmra.mxu2 %v748_v17 }
  0x94   :  { %245 = vmatmul.f32.gmra.mxu1 %v748_v17  ;;  %375 = vmatmul.f32.gmra.mxu3 %v748_v17 }
  0x9a   :  { %440 = vmatmul.f32.gmra.mxu0 %v748_v17 }
  0x9b   :  { %313 = vmatmul.f32.gmra.mxu2 %v758_v33 }
  0x9c   :  { %248 = vmatmul.f32.gmra.mxu1 %v758_v33  ;;  %378 = vmatmul.f32.gmra.mxu3 %v758_v33 }
  0xa2   :  { %443 = vmatmul.f32.gmra.mxu0 %v758_v33 }
  0xa3   :  { %316 = vmatmul.f32.gmra.mxu2 %v769_v53 }
  0xa4   :  { %251 = vmatmul.f32.gmra.mxu1 %v769_v53  ;;  %381 = vmatmul.f32.gmra.mxu3 %v769_v53 }
  0xa9   :  { %v830_v16 = vpop.f32.mrf.mxu1 }
  0xaa   :  { %446 = vmatmul.f32.gmra.mxu0 %v769_v53 }
  0xab   :  { %319 = vmatmul.f32.gmra.mxu2 %v781_v9 }
  0xac   :  { %254 = vmatmul.f32.gmra.mxu1 %v781_v9  ;;  %384 = vmatmul.f32.gmra.mxu3 %v781_v9 }
  0xae   :  { %v157_v17 = vpop.f32.mrf.mxu0 }
  0xb0   :  { %v836_v25 = vpop.f32.mrf.mxu2  ;;  %v838_v33 = vpop.f32.mrf.mxu3 }
  0xb2   :  { %449 = vmatmul.f32.gmra.mxu0 %v781_v9 }
  0xb3   :  { %322 = vmatmul.f32.gmra.mxu2 %v750_v18  ;;  %v842_v34 = vpop.f32.mrf.mxu1 }
  0xb4   :  { %257 = vmatmul.f32.gmra.mxu1 %v750_v18  ;;  %387 = vmatmul.f32.gmra.mxu3 %v750_v18 }
  0xb8   :  { %v846_v39 = vpop.f32.mrf.mxu2 }
  0xb9   :  { %v848_v40 = vpop.f32.mrf.mxu3 }
  0xba   :  { %452 = vmatmul.f32.gmra.mxu0 %v750_v18  ;;  %v160_v41 = vpop.f32.mrf.mxu0 }
  0xbb   :  { %325 = vmatmul.f32.gmra.mxu2 %v762_v35 }
  0xbc   :  { %260 = vmatmul.f32.gmra.mxu1 %v762_v35  ;;  %390 = vmatmul.f32.gmra.mxu3 %v762_v35 }
  0xbd   :  { %v854_v42 = vpop.f32.mrf.mxu1 }
  0xc2   :  { %455 = vmatmul.f32.gmra.mxu0 %v762_v35  ;;  %v857_v43 = vpop.f32.mrf.mxu2 }
  0xc3   :  { %328 = vmatmul.f32.gmra.mxu2 %v774_v55  ;;  %v860_v44 = vpop.f32.mrf.mxu3 }
  0xc4   :  { %263 = vmatmul.f32.gmra.mxu1 %v774_v55  ;;  %393 = vmatmul.f32.gmra.mxu3 %v774_v55  ;;  %v163_v18 = vpop.f32.mrf.mxu0 }
  0xc7   :  { %v864_v45 = vpop.f32.mrf.mxu1 }
  0xca   :  { %458 = vmatmul.f32.gmra.mxu0 %v774_v55 }
  0xcb   :  { %331 = vmatmul.f32.gmra.mxu2 %v786_v11 }
  0xcc   :  { %266 = vmatmul.f32.gmra.mxu1 %v786_v11  ;;  %396 = vmatmul.f32.gmra.mxu3 %v786_v11  ;;  %v870_v35 = vpop.f32.mrf.mxu2 }
  0xcd   :  { %v872_v46 = vpop.f32.mrf.mxu3 }
  0xce   :  { %v166_v47 = vpop.f32.mrf.mxu0 }
  0xd1   :  { %v222_v48 = vpop.f32.mrf.mxu1 }
  0xd2   :  { %v465_v49 = vpack.c.bf16 %v222_v48, %v157_v17  ;;  %461 = vmatmul.f32.gmra.mxu0 %v786_v11 }
  0xd4   :  { %513 = vst [vmem:[#allocation7] sm:$0xff] %v465_v49 }
  0xd6   :  { %v287_v50 = vpop.f32.mrf.mxu2 }
  0xd7   :  { %v352_v51 = vpop.f32.mrf.mxu3  ;;  %v417_v52 = vpop.f32.mrf.mxu0 }
  0xd8   :  { %v466_v53 = vpack.c.bf16 %v352_v51, %v287_v50  ;;  %v467_v54 = vpack.c.bf16 %v417_v52, %v417_v52 }
  0xd9   :  { %v225_v55 = vpop.f32.mrf.mxu1 }
  0xda   :  { %514 = vst [vmem:[#allocation7 + $0x8] sm:$0xff] %v466_v53  ;;  %v468_v56 = vpack.c.bf16 %v225_v55, %v160_v41 }
  0xdb   :  { %515 = vst [vmem:[#allocation7 + $0x10] sm:$0xf] %v467_v54 }
  0xdc   :  { %516 = vst [vmem:[#allocation7 + $0x14] sm:$0xff] %v468_v56 }
  0xde   :  { %v290_v57 = vpop.f32.mrf.mxu2 }
  0xdf   :  { %v355_v58 = vpop.f32.mrf.mxu3  ;;  %v420_v59 = vpop.f32.mrf.mxu0 }
  0xe0   :  { %v469_v60 = vpack.c.bf16 %v355_v58, %v290_v57  ;;  %v470_v61 = vpack.c.bf16 %v420_v59, %v420_v59 }
  0xe1   :  { %v228_v62 = vpop.f32.mrf.mxu1 }
  0xe2   :  { %517 = vst [vmem:[#allocation7 + $0x1c] sm:$0xff] %v469_v60  ;;  %v471_v63 = vpack.c.bf16 %v228_v62, %v163_v18 }
  0xe3   :  { %518 = vst [vmem:[#allocation7 + $0x24] sm:$0xf] %v470_v61 }
  0xe4   :  { %519 = vst [vmem:[#allocation7 + $0x28] sm:$0xff] %v471_v63 }
  0xe6   :  { %v293_v0 = vpop.f32.mrf.mxu2 }
  0xe7   :  { %v358_v1 = vpop.f32.mrf.mxu3  ;;  %v423_v2 = vpop.f32.mrf.mxu0 }
  0xe8   :  { %v472_v3 = vpack.c.bf16 %v358_v1, %v293_v0  ;;  %v473_v4 = vpack.c.bf16 %v423_v2, %v423_v2 }
  0xe9   :  { %v231_v5 = vpop.f32.mrf.mxu1 }
  0xea   :  { %520 = vst [vmem:[#allocation7 + $0x30] sm:$0xff] %v472_v3  ;;  %v474_v6 = vpack.c.bf16 %v231_v5, %v166_v47 }
  0xeb   :  { %521 = vst [vmem:[#allocation7 + $0x38] sm:$0xf] %v473_v4 }
  0xec   :  { %522 = vst [vmem:[#allocation7 + $0x3c] sm:$0xff] %v474_v6 }
  0xee   :  { %v296_v7 = vpop.f32.mrf.mxu2 }
  0xef   :  { %v361_v8 = vpop.f32.mrf.mxu3  ;;  %v426_v9 = vpop.f32.mrf.mxu0 }
  0xf0   :  { %v475_v10 = vpack.c.bf16 %v361_v8, %v296_v7  ;;  %v476_v11 = vpack.c.bf16 %v426_v9, %v426_v9 }
  0xf1   :  { %v234_v12 = vpop.f32.mrf.mxu1 }
  0xf2   :  { %523 = vst [vmem:[#allocation7 + $0x44] sm:$0xff] %v475_v10  ;;  %v477_v13 = vpack.c.bf16 %v234_v12, %v830_v16 }
  0xf3   :  { %524 = vst [vmem:[#allocation7 + $0x4c] sm:$0xf] %v476_v11 }
  0xf4   :  { %525 = vst [vmem:[#allocation7 + $0x50] sm:$0xff] %v477_v13 }
  0xf6   :  { %v299_v14 = vpop.f32.mrf.mxu2 }
  0xf7   :  { %v364_v15 = vpop.f32.mrf.mxu3  ;;  %v429_v19 = vpop.f32.mrf.mxu0 }
  0xf8   :  { %v478_v20 = vpack.c.bf16 %v364_v15, %v299_v14  ;;  %v479_v21 = vpack.c.bf16 %v429_v19, %v429_v19 }
  0xf9   :  { %v237_v22 = vpop.f32.mrf.mxu1 }
  0xfa   :  { %526 = vst [vmem:[#allocation7 + $0x58] sm:$0xff] %v478_v20  ;;  %v480_v23 = vpack.c.bf16 %v237_v22, %v842_v34 }
  0xfb   :  { %527 = vst [vmem:[#allocation7 + $0x60] sm:$0xf] %v479_v21 }
  0xfc   :  { %528 = vst [vmem:[#allocation7 + $0x64] sm:$0xff] %v480_v23 }
  0xfe   :  { %v302_v24 = vpop.f32.mrf.mxu2 }
  0xff   :  { %v367_v26 = vpop.f32.mrf.mxu3  ;;  %v432_v27 = vpop.f32.mrf.mxu0 }
 0x100   :  { %v481_v28 = vpack.c.bf16 %v367_v26, %v302_v24  ;;  %v482_v29 = vpack.c.bf16 %v432_v27, %v432_v27 }
 0x101   :  { %v240_v30 = vpop.f32.mrf.mxu1 }
 0x102   :  { %529 = vst [vmem:[#allocation7 + $0x6c] sm:$0xff] %v481_v28  ;;  %v483_v31 = vpack.c.bf16 %v240_v30, %v854_v42 }
 0x103   :  { %530 = vst [vmem:[#allocation7 + $0x74] sm:$0xf] %v482_v29 }
 0x104   :  { %531 = vst [vmem:[#allocation7 + $0x78] sm:$0xff] %v483_v31 }
 0x106   :  { %v305_v32 = vpop.f32.mrf.mxu2 }
 0x107   :  { %v370_v36 = vpop.f32.mrf.mxu3  ;;  %v435_v37 = vpop.f32.mrf.mxu0 }
 0x108   :  { %v484_v38 = vpack.c.bf16 %v370_v36, %v305_v32  ;;  %v485_v16 = vpack.c.bf16 %v435_v37, %v435_v37 }
 0x109   :  { %v243_v17 = vpop.f32.mrf.mxu1 }
 0x10a   :  { %532 = vst [vmem:[#allocation7 + $0x80] sm:$0xff] %v484_v38  ;;  %v486_v34 = vpack.c.bf16 %v243_v17, %v864_v45 }
 0x10b   :  { %533 = vst [vmem:[#allocation7 + $0x88] sm:$0xf] %v485_v16 }
 0x10c   :  { %534 = vst [vmem:[#allocation7 + $0x8c] sm:$0xff] %v486_v34 }
 0x10e   :  { %v308_v41 = vpop.f32.mrf.mxu2 }
 0x10f   :  { %v373_v18 = vpop.f32.mrf.mxu3  ;;  %v438_v47 = vpop.f32.mrf.mxu0 }
 0x110   :  { %v487_v48 = vpack.c.bf16 %v373_v18, %v308_v41  ;;  %v488_v49 = vpack.c.bf16 %v438_v47, %v438_v47 }
 0x111   :  { %v246_v50 = vpop.f32.mrf.mxu1 }
 0x112   :  { %535 = vst [vmem:[#allocation7 + $0x94] sm:$0xff] %v487_v48  ;;  %v489_v42 = vpack.c.bf16 %v246_v50, %v836_v25 }
 0x113   :  { %536 = vst [vmem:[#allocation7 + $0x9c] sm:$0xf] %v488_v49 }
 0x114   :  { %537 = vst [vmem:[#allocation7 + $0xa0] sm:$0xff] %v489_v42 }
 0x116   :  { %v311_v51 = vpop.f32.mrf.mxu2 }
 0x117   :  { %v376_v52 = vpop.f32.mrf.mxu3  ;;  %v441_v53 = vpop.f32.mrf.mxu0 }
 0x118   :  { %v490_v54 = vpack.c.bf16 %v376_v52, %v311_v51  ;;  %v491_v55 = vpack.c.bf16 %v441_v53, %v441_v53 }
 0x119   :  { %v249_v56 = vpop.f32.mrf.mxu1 }
 0x11a   :  { %538 = vst [vmem:[#allocation7 + $0xa8] sm:$0xff] %v490_v54  ;;  %v492_v45 = vpack.c.bf16 %v249_v56, %v846_v39 }
 0x11b   :  { %539 = vst [vmem:[#allocation7 + $0xb0] sm:$0xf] %v491_v55 }
 0x11c   :  { %540 = vst [vmem:[#allocation7 + $0xb4] sm:$0xff] %v492_v45 }
 0x11e   :  { %v314_v57 = vpop.f32.mrf.mxu2 }
 0x11f   :  { %v379_v58 = vpop.f32.mrf.mxu3  ;;  %v444_v59 = vpop.f32.mrf.mxu0 }
 0x120   :  { %v493_v60 = vpack.c.bf16 %v379_v58, %v314_v57  ;;  %v494_v61 = vpack.c.bf16 %v444_v59, %v444_v59 }
 0x121   :  { %v252_v62 = vpop.f32.mrf.mxu1 }
 0x122   :  { %541 = vst [vmem:[#allocation7 + $0xbc] sm:$0xff] %v493_v60  ;;  %v495_v25 = vpack.c.bf16 %v252_v62, %v857_v43 }
 0x123   :  { %542 = vst [vmem:[#allocation7 + $0xc4] sm:$0xf] %v494_v61 }
 0x124   :  { %543 = vst [vmem:[#allocation7 + $0xc8] sm:$0xff] %v495_v25 }
 0x126   :  { %v317_v63 = vpop.f32.mrf.mxu2 }
 0x127   :  { %v382_v0 = vpop.f32.mrf.mxu3  ;;  %v447_v1 = vpop.f32.mrf.mxu0 }
 0x128   :  { %v496_v2 = vpack.c.bf16 %v382_v0, %v317_v63  ;;  %v497_v3 = vpack.c.bf16 %v447_v1, %v447_v1 }
 0x129   :  { %v255_v4 = vpop.f32.mrf.mxu1 }
 0x12a   :  { %544 = vst [vmem:[#allocation7 + $0xd0] sm:$0xff] %v496_v2  ;;  %v498_v39 = vpack.c.bf16 %v255_v4, %v870_v35 }
 0x12b   :  { %545 = vst [vmem:[#allocation7 + $0xd8] sm:$0xf] %v497_v3 }
 0x12c   :  { %546 = vst [vmem:[#allocation7 + $0xdc] sm:$0xff] %v498_v39 }
 0x12e   :  { %v320_v5 = vpop.f32.mrf.mxu2 }
 0x12f   :  { %v385_v6 = vpop.f32.mrf.mxu3  ;;  %v450_v7 = vpop.f32.mrf.mxu0 }
 0x130   :  { %v499_v8 = vpack.c.bf16 %v385_v6, %v320_v5  ;;  %v500_v9 = vpack.c.bf16 %v450_v7, %v450_v7 }
 0x131   :  { %v258_v10 = vpop.f32.mrf.mxu1 }
 0x132   :  { %547 = vst [vmem:[#allocation7 + $0xe4] sm:$0xff] %v499_v8  ;;  %v501_v43 = vpack.c.bf16 %v258_v10, %v838_v33 }
 0x133   :  { %548 = vst [vmem:[#allocation7 + $0xec] sm:$0xf] %v500_v9 }
 0x134   :  { %549 = vst [vmem:[#allocation7 + $0xf0] sm:$0xff] %v501_v43 }
 0x136   :  { %v323_v11 = vpop.f32.mrf.mxu2 }
 0x137   :  { %v388_v12 = vpop.f32.mrf.mxu3  ;;  %v453_v13 = vpop.f32.mrf.mxu0 }
 0x138   :  { %v502_v14 = vpack.c.bf16 %v388_v12, %v323_v11  ;;  %v503_v15 = vpack.c.bf16 %v453_v13, %v453_v13 }
 0x139   :  { %v261_v19 = vpop.f32.mrf.mxu1 }
 0x13a   :  { %550 = vst [vmem:[#allocation7 + $0xf8] sm:$0xff] %v502_v14  ;;  %v504_v35 = vpack.c.bf16 %v261_v19, %v848_v40 }
 0x13b   :  { %551 = vst [vmem:[#allocation7 + $0x100] sm:$0xf] %v503_v15 }
 0x13c   :  { %552 = vst [vmem:[#allocation7 + $0x104] sm:$0xff] %v504_v35 }
 0x13e   :  { %v326_v20 = vpop.f32.mrf.mxu2 }
 0x13f   :  { %v391_v21 = vpop.f32.mrf.mxu3  ;;  %v456_v22 = vpop.f32.mrf.mxu0 }
 0x140   :  { %v505_v23 = vpack.c.bf16 %v391_v21, %v326_v20  ;;  %v506_v24 = vpack.c.bf16 %v456_v22, %v456_v22 }
 0x141   :  { %v264_v26 = vpop.f32.mrf.mxu1 }
 0x142   :  { %553 = vst [vmem:[#allocation7 + $0x10c] sm:$0xff] %v505_v23  ;;  %v507_v33 = vpack.c.bf16 %v264_v26, %v860_v44 }
 0x143   :  { %554 = vst [vmem:[#allocation7 + $0x114] sm:$0xf] %v506_v24 }
 0x144   :  { %555 = vst [vmem:[#allocation7 + $0x118] sm:$0xff] %v507_v33 }
 0x146   :  { %v329_v27 = vpop.f32.mrf.mxu2 }
 0x147   :  { %v394_v28 = vpop.f32.mrf.mxu3  ;;  %v459_v29 = vpop.f32.mrf.mxu0 }
 0x148   :  { %v508_v30 = vpack.c.bf16 %v394_v28, %v329_v27  ;;  %v509_v31 = vpack.c.bf16 %v459_v29, %v459_v29 }
 0x149   :  { %v267_v32 = vpop.f32.mrf.mxu1 }
 0x14a   :  { %556 = vst [vmem:[#allocation7 + $0x120] sm:$0xff] %v508_v30  ;;  %v510_v40 = vpack.c.bf16 %v267_v32, %v872_v46 }
 0x14b   :  { %557 = vst [vmem:[#allocation7 + $0x128] sm:$0xf] %v509_v31 }
 0x14c   :  { %558 = vst [vmem:[#allocation7 + $0x12c] sm:$0xff] %v510_v40 }
 0x14e   :  { %v332_v44 = vpop.f32.mrf.mxu2 }
 0x14f   :  { %v397_v36 = vpop.f32.mrf.mxu3  ;;  %v462_v37 = vpop.f32.mrf.mxu0 }
 0x150   :  { %v511_v38 = vpack.c.bf16 %v397_v36, %v332_v44  ;;  %v512_v16 = vpack.c.bf16 %v462_v37, %v462_v37 }
 0x152   :  { %559 = vst [vmem:[#allocation7 + $0x134] sm:$0xff] %v511_v38 }
 0x153   :  { %560 = vst [vmem:[#allocation7 + $0x13c] sm:$0xf] %v512_v16 }
 0x154   :  { %573 = dma.vmem_to_hbm [thread:$0]  %s566_s1, 5120, %s568_s25, [#allocation4], %s723_s26, %s723_s26, %s724_s27  }
 0x155   :  { %714 = dma.done.wait [#allocation4], 5120  }
 0x156   :  { %715 = vsyncadd [#allocation4], 4294962176 }
 0x157   :  { %578 = vsyncpa [#allocation3], 1 }
 0x158   :  { %579 = vsyncpa [#allocation6], 1 }
 0x159   :  { %580 = vsyncpa [#allocation4], 1 }

</bundles_post_ra>
